<compile_context>
chip_gen: v6e
topology: v6e:2x2x1
jax: 0.10.0
libtpu: 0.0.40
codegen_flags: <defaults>
</compile_context>

<pallas_src>
import numpy as np
import jax
import jax.numpy as jnp
from jax.experimental import pallas as pl
from jax.experimental.pallas import tpu as pltpu


def _pick_tile(m_sp, c, probs_bpe, tm_max):
    """Largest lane tile (multiple of 128) under a conservative VMEM budget."""
    # double-buffered probs + targets tiles, plus the resident f32 accumulator block
    bytes_per_lane = 2 * (c * probs_bpe + 4) + 4
    budget = 16 * 1024 * 1024
    cap = max(128, (budget // bytes_per_lane) // 128 * 128)
    tm = max(128, (min(int(tm_max), cap) // 128) * 128)
    if m_sp < tm:
        tm = max(128, ((m_sp + 127) // 128) * 128)
    return tm


def cross_entropy_loss_3d(inputs, targets, *, tm_max=32768):
    """inputs: (N, C, D, H, W) probabilities; targets: (N, D, H, W) int class ids.

    Returns scalar mean NLL loss == nn.NLLLoss(torch.log(inputs), targets)
    with weight=None, size_average=True.
    """
    # TODO(synk): per-class `weight` tensor of nn.NLLLoss not implemented (module default is None).
    N, C = int(inputs.shape[0]), int(inputs.shape[1])
    spatial = inputs.shape[2:]
    M_sp = int(np.prod(spatial)) if len(spatial) else 1
    M_total = N * M_sp

    # Free, contiguous reshapes (no HBM transpose):
    probs = inputs.reshape(N, C, M_sp)                  # keep native dtype (f32 or bf16)
    tgt = targets.reshape(N, 1, M_sp).astype(jnp.int32)

    TM = _pick_tile(M_sp, C, probs.dtype.itemsize, tm_max)
    num_tiles = pl.cdiv(M_sp, TM)
    needs_mask = (M_sp % TM) != 0

    def kernel(probs_ref, tgt_ref, acc_ref):
        i = pl.program_id(1)

        @pl.when(i == 0)
        def _():
            acc_ref[...] = jnp.zeros_like(acc_ref)

        p = probs_ref[...].astype(jnp.float32)          # (1, C, TM)
        t = tgt_ref[...]                                # (1, 1, TM)

        # gather target-class probability per pixel (compare + select + sublane sum)
        cls = jax.lax.broadcasted_iota(jnp.int32, p.shape, 1)          # (1, C, TM)
        p_t = jnp.sum(jnp.where(cls == t, p, 0.0), axis=1, keepdims=True)  # (1, 1, TM)

        if needs_mask:
            lane = jax.lax.broadcasted_iota(jnp.int32, p_t.shape, 2)
            p_t = jnp.where(i * TM + lane < M_sp, p_t, 1.0)  # padded lanes -> -log(1) = 0

        acc_ref[...] += -jnp.log(p_t)                   # pure VPU/EUP; no cross-lane reduce

    partials = pl.pallas_call(
        kernel,
        out_shape=jax.ShapeDtypeStruct((N, 1, TM), jnp.float32),
        grid_spec=pltpu.PrefetchScalarGridSpec(
            num_scalar_prefetch=0,
            grid=(N, num_tiles),
            in_specs=[
                pl.BlockSpec((1, C, TM), lambda n, i: (n, 0, i)),
                pl.BlockSpec((1, 1, TM), lambda n, i: (n, 0, i)),
            ],
            out_specs=pl.BlockSpec((1, 1, TM), lambda n, i: (n, 0, 0)),
        ),
        compiler_params=pltpu.CompilerParams(
            dimension_semantics=("parallel", "arbitrary")),
    )(probs, tgt)

    # size_average=True, weight=None -> mean over all target elements
    return jnp.sum(partials) / jnp.float32(M_total)


if __name__ == "__main__":
    key = jax.random.PRNGKey(0)
    k1, k2 = jax.random.split(key)

    # small 3D volume with a ragged spatial size: N=2, C=4, D=3, H=7, W=10 -> M_sp = 210
    N, C, D, H, W = 2, 4, 3, 7, 10
    logits = jax.random.normal(k1, (N, C, D, H, W), dtype=jnp.float32)
    probs = jax.nn.softmax(logits, axis=1)              # valid probabilities over C
    targets = jax.random.randint(k2, (N, D, H, W), 0, C, dtype=jnp.int32)

    # pure-JAX reference (same math as nn.NLLLoss(torch.log(probs), targets))
    log_p = jnp.log(probs)
    picked = jnp.take_along_axis(log_p, targets[:, None], axis=1)
    ref = -jnp.mean(picked)

    # default (large-tile) path: single ragged tile per sample
    loss = cross_entropy_loss_3d(probs, targets)
    # small-tile path: exercises multi-tile accumulation + ragged tail masking
    loss_small = cross_entropy_loss_3d(probs, targets, tm_max=128)
    jax.block_until_ready((loss, loss_small))

    assert np.allclose(np.asarray(loss), np.asarray(ref), rtol=1e-5, atol=1e-6), \
        (float(loss), float(ref))
    assert np.allclose(np.asarray(loss_small), np.asarray(ref), rtol=1e-5, atol=1e-6), \
        (float(loss_small), float(ref))

    print("KERNEL_OK")
</pallas_src>

<mosaic_0001>
module attributes {stable_mosaic.version = 11 : i64} {
  func.func @kernel(%arg0: i32, %arg1: i32, %arg2: memref<1x4x256xf32, #tpu.memory_space<vmem>>, %arg3: memref<1x1x256xi32, #tpu.memory_space<vmem>>, %arg4: memref<1x1x256xf32, #tpu.memory_space<vmem>>) attributes {dimension_semantics = [#tpu.dimension_semantics<parallel>, #tpu.dimension_semantics<arbitrary>], iteration_bounds = array<i64: 2, 1>, scalar_prefetch = 0 : i64, scratch_operands = 0 : i64, tpu.core_type = #tpu.core_type<tc>, window_params = [{transform_indices = @transform_0, window_bounds = array<i64: 1, 4, 256>}, {transform_indices = @transform_1, window_bounds = array<i64: 1, 1, 256>}, {transform_indices = @transform_2, window_bounds = array<i64: 1, 1, 256>}]} {
    %c0_i32 = arith.constant 0 : i32
    %0 = arith.cmpi eq, %arg1, %c0_i32 : i32
    %1 = arith.extui %0 : i1 to i32
    %c0_i32_0 = arith.constant 0 : i32
    %2 = arith.cmpi ne, %1, %c0_i32_0 : i32
    scf.if %2 {
      %cst_15 = arith.constant 0.000000e+00 : f32
      %26 = vector.broadcast %cst_15 : f32 to vector<1x1x256xf32>
      %c0_16 = arith.constant 0 : index
      %c0_17 = arith.constant 0 : index
      %c0_18 = arith.constant 0 : index
      %27 = vector.load %arg4[%c0_16, %c0_17, %c0_18] : memref<1x1x256xf32, #tpu.memory_space<vmem>>, vector<1x1x256xf32>
      tpu.vector_store %arg4[%c0_16, %c0_17, %c0_18], %26 {strides = array<i32>} : memref<1x1x256xf32, #tpu.memory_space<vmem>>, vector<1x1x256xf32>,
    } else {
    }
    %c0 = arith.constant 0 : index
    %c0_1 = arith.constant 0 : index
    %c0_2 = arith.constant 0 : index
    %3 = vector.load %arg2[%c0, %c0_1, %c0_2] : memref<1x4x256xf32, #tpu.memory_space<vmem>>, vector<1x4x256xf32>
    %c0_3 = arith.constant 0 : index
    %c0_4 = arith.constant 0 : index
    %c0_5 = arith.constant 0 : index
    %4 = vector.load %arg3[%c0_3, %c0_4, %c0_5] : memref<1x1x256xi32, #tpu.memory_space<vmem>>, vector<1x1x256xi32>
    %5 = tpu.iota {dimensions = array<i32: 1>} : vector<1x4x256xi32>
    %6 = vector.broadcast %4 : vector<1x1x256xi32> to vector<1x4x256xi32>
    %7 = arith.cmpi eq, %5, %6 : vector<1x4x256xi32>
    %cst = arith.constant 0.000000e+00 : f32
    %8 = vector.broadcast %cst : f32 to vector<1x4x256xf32>
    %9 = arith.select %7, %3, %8 : vector<1x4x256xi1>, vector<1x4x256xf32>
    %cst_6 = arith.constant dense<0.000000e+00> : vector<1x256xf32>
    %10 = vector.multi_reduction <add>, %9, %cst_6 [1] : vector<1x4x256xf32> to vector<1x256xf32>
    %11 = vector.shape_cast %10 : vector<1x256xf32> to vector<1x1x256xf32>
    %12 = tpu.iota {dimensions = array<i32: 2>} : vector<1x1x256xi32>
    %c256_i32 = arith.constant 256 : i32
    %13 = arith.muli %arg1, %c256_i32 : i32
    %14 = vector.broadcast %13 : i32 to vector<1x1x256xi32>
    %15 = arith.addi %14, %12 : vector<1x1x256xi32>
    %c210_i32 = arith.constant 210 : i32
    %16 = vector.broadcast %c210_i32 : i32 to vector<1x1x256xi32>
    %17 = arith.cmpi slt, %15, %16 : vector<1x1x256xi32>
    %cst_7 = arith.constant 1.000000e+00 : f32
    %18 = vector.broadcast %cst_7 : f32 to vector<1x1x256xf32>
    %19 = arith.select %17, %11, %18 : vector<1x1x256xi1>, vector<1x1x256xf32>
    %c0_8 = arith.constant 0 : index
    %c0_9 = arith.constant 0 : index
    %c0_10 = arith.constant 0 : index
    %20 = vector.load %arg4[%c0_8, %c0_9, %c0_10] : memref<1x1x256xf32, #tpu.memory_space<vmem>>, vector<1x1x256xf32>
    %21 = math.log %19 : vector<1x1x256xf32>
    %cst_11 = arith.constant 0.000000e+00 : f32
    %22 = vector.broadcast %cst_11 : f32 to vector<1x1x256xf32>
    %23 = arith.subf %22, %21 : vector<1x1x256xf32>
    %24 = arith.addf %20, %23 : vector<1x1x256xf32>
    %c0_12 = arith.constant 0 : index
    %c0_13 = arith.constant 0 : index
    %c0_14 = arith.constant 0 : index
    %25 = vector.load %arg4[%c0_12, %c0_13, %c0_14] : memref<1x1x256xf32, #tpu.memory_space<vmem>>, vector<1x1x256xf32>
    tpu.vector_store %arg4[%c0_12, %c0_13, %c0_14], %24 {strides = array<i32>} : memref<1x1x256xf32, #tpu.memory_space<vmem>>, vector<1x1x256xf32>,
    return
  }
  func.func @transform_0(%arg0: i32, %arg1: i32) -> (i32, i32, i32) {
    %c0_i32 = arith.constant 0 : i32
    %c0_i32_0 = arith.constant 0 : i32
    return %arg0, %c0_i32, %arg1 : i32, i32, i32
  }
  func.func @transform_1(%arg0: i32, %arg1: i32) -> (i32, i32, i32) {
    %c0_i32 = arith.constant 0 : i32
    %c0_i32_0 = arith.constant 0 : i32
    return %arg0, %c0_i32, %arg1 : i32, i32, i32
  }
  func.func @transform_2(%arg0: i32, %arg1: i32) -> (i32, i32, i32) {
    %c0_i32 = arith.constant 0 : i32
    %c0_i32_0 = arith.constant 0 : i32
    %c0_i32_1 = arith.constant 0 : i32
    return %arg0, %c0_i32, %c0_i32_0 : i32, i32, i32
  }
}

</mosaic_0001>

<bundles_post_ra>
// kernel: tpu_custom_call.1
= control target key start
LH: loop header
LB: loop body
LE: loop exit
PB: predicated region body
PF: predicated region fallthrough
CT: control target
= control target key end

     0   :  { %7 = vsyncpa [#allocation3], 0  ;;  %s863_s0 = inlined_call_operand.hbm [shape: f32[2,4,210], index: 0, kind: input, shape index: {}]   ;;  %s864_s1 = inlined_call_operand.hbm [shape: s32[2,1,210], index: 1, kind: input, shape index: {}]   ;;  %s865_s2 = inlined_call_operand.hbm [shape: f32[2,1,256], index: 2, kind: output, shape index: {}]  }
   0x1   :  { %9 = vsyncpa [#allocation3 + $0x1], 0 }
   0x2   :  { %10 = vsyncpa [#allocation6], 0 }
   0x3   :  { %12 = vsyncpa [#allocation6 + $0x1], 0 }
   0x4   :  { %13 = vsyncpa [#allocation4], 0 }
   0x5   :  { %15 = vsyncpa [#allocation4 + $0x1], 0  ;;  %s685_s9 = smov 0   ;;  %s687_s10 = smov 0  }
   0x6   :  { %s689_s11 = smov 0   ;;  %s691_s12 = smov 0  }
   0x7   :  { %s693_s13 = smov 0   ;;  %s695_s14 = smov 0  }
   0x8 LB: > { %s427_s15 = sadd.s32 4294967295, %s663_s14   ;;  %s428_s16 = sadd.s32 4294967294, %s663_s14   ;;  %s663_s14 = sphi %s695_s14, %s21_s14   ;;  %s659_s13 = sphi %s693_s13, %s879_s13   ;;  %s655_s12 = sphi %s691_s12, %s878_s12   ;;  %s651_s11 = sphi %s689_s11, %s877_s11   ;;  %s647_s10 = sphi %s687_s10, %s876_s10   ;;  %s643_s9 = sphi %s685_s9, %s875_s9  }
   0x9   : > { %s33_s17 = sadd.s32 1, %s659_s13  ;;  %s42_s18 = sadd.s32 1, %s651_s11 }
   0xa   : > { %p35_p0 = scmp.ge.s32.totalorder %s33_s17, 2  ;;  %p49_p1 = scmp.ne.s32.totalorder %s651_s11, %s647_s10 }
   0xb   : > { %p50_p2 = scmp.eq.s32.totalorder %s663_s14, 0  ;;  %p55_p3 = scmp.ne.s32.totalorder %s647_s10, %s643_s9 }
   0xc   : > { %s881_s17 = smov (%p35_p0, %s33_s17), 0  ;;  %p56_p5 = scmp.eq.s32.totalorder %s427_s15, 0 }
   0xd   : > { %p726_p4 = por %p50_p2, %p49_p1  ;;  %s37_s20 = ssub.s32 %s659_s13, %s881_s17 }
   0xe   : > { %p107_p6 = scmp.eq.s32.totalorder %s427_s15, 1  ;;  %p40_p7 = scmp.eq.s32.totalorder %s37_s20, 0 }
   0xf   : > { %p732_p8 = por %p56_p5, %p55_p3  ;;  %p113_p10 = scmp.eq.s32.totalorder %s428_s16, 1 }
  0x10   : > { %p736_p9 = por %p107_p6, %p49_p1  ;;  %p466_p13 = scmp.lt.s32.totalorder %s663_s14, 2 }
  0x11   : > { %s741_s23 = scalar_select %p40_p7, %s651_s11, %s42_s18  }
  0x12   : > { %p743_p11 = por %p113_p10, %p55_p3  ;;  %s750_s25 = sand.u32 1, %s651_s11  }
  0x13   : > { %s431_s26 = sshll.u32 %s750_s25, 3  ;;  %s446_s27 = sshll.u32 %s659_s13, 7 }
  0x14   : > { %s145_s30 = scalar_lea.hbm %s863_s0, %s446_s27  ;;  %s137_s3 = scalar_lea.vmem [#allocation2], %s431_s26 }
  0x15   : > { %s147_s4 = sshll.u32 %s137_s3, 4  ;;  %p759_p0 = pnand %p466_p13, %p726_p4  ;;  %s148_s4 = int_to_ptr.vmem [resolvable:$true] %s147_s4 }
  0x16   : > { %p437_p1 = scmp.ge.s32.totalorder %s663_s14, 1  ;;  %p173_p2 = scmp.lt.s32.totalorder %s663_s14, 3 }
  0x17   : > { %s134_s6 = scalar_lea.sflag [#allocation3], %s750_s25  ;;  %p525_p3 = pneg %p759_p0 }
  0x18   : > { %s536_s7 = scalar_lea.vmem %s148_s4, 128  ;;  %s665_s8 = smov [#allocation2]  }
  0x19   : > { %p537_p5 = scmp.ne.s32.totalorder %s148_s4, %s536_s7  ;;  %s541_s15 = sshll.u32 %s665_s8, 4  ;;  %s542_s15 = int_to_ptr.vmem [resolvable:$false] %s541_s15 }
  0x1a   : > { %s543_s16 = scalar_lea.vmem %s542_s15, 256  ;;  %p544_p4 = scmp.lt.s32.totalorder %s148_s4, %s542_s15 }
  0x1b   : > { %p539_p6 = pnand %p537_p5, %p525_p3  ;;  %p545_p10 = scmp.lt.s32.totalorder %s543_s16, %s536_s7 }
  0x1d   : > { %p540_p7 = pneg %p539_p6  ;;  %p546_p13 = por %p545_p10, %p544_p4 }
  0x1f   : > { %p547_p12 = pnand %p546_p13, %p540_p7 }
  0x21   : > { %550 = shalt.err (!%p547_p12)
}
  0x22   : > { %458 = dma.hbm_to_vmem [thread:$0]  (!%p759_p0), %s145_s30, 128, %s148_s4, %s134_s6  }
  0x23   : > { %p777_p5 = pnand %p437_p1, %p173_p2  ;;  %s434_s19 = sshll.u32 %s750_s25, 1 }
  0x24   : > { %s447_s20 = sshll.u32 %s659_s13, 5  ;;  %s158_s29 = scalar_lea.vmem [#allocation5], %s434_s19 }
  0x25   : > { %s166_s28 = scalar_lea.hbm %s864_s1, %s447_s20  ;;  %s168_s3 = sshll.u32 %s158_s29, 4  ;;  %s169_s3 = int_to_ptr.vmem [resolvable:$true] %s168_s3 }
  0x26   : > { %s155_s7 = scalar_lea.sflag [#allocation6], %s750_s25  ;;  %s564_s8 = scalar_lea.vmem %s169_s3, 32 }
  0x27   : > { %p565_p12 = scmp.ne.s32.totalorder %s169_s3, %s564_s8  ;;  %s666_s30 = smov [#allocation5]  }
  0x28   : > { %s569_s4 = sshll.u32 %s666_s30, 4  ;;  %s570_s4 = int_to_ptr.vmem [resolvable:$false] %s569_s4 }
  0x29   : > { %p567_p6 = pnand %p565_p12, %p525_p3  ;;  %s571_s6 = scalar_lea.vmem %s570_s4, 64 }
  0x2a   : > { %p572_p1 = scmp.lt.s32.totalorder %s169_s3, %s570_s4  ;;  %p573_p2 = scmp.lt.s32.totalorder %s571_s6, %s564_s8 }
  0x2b   : > { %p568_p7 = pneg %p567_p6 }
  0x2c   : > { %p574_p4 = por %p573_p2, %p572_p1 }
  0x2e   : > { %p575_p10 = pnand %p574_p4, %p568_p7 }
  0x30   : > { %578 = shalt.err (!%p575_p10)
}
  0x31   : > { %461 = dma.hbm_to_vmem [thread:$0]  (!%p759_p0), %s166_s28, 32, %s169_s3, %s155_s7  }
  0x32   : > { %177 = sbr.rel (%p777_p5) target bundleno = 122 (0x7a), region = 28  ;;  %s795_s25 = sand.u32 (!%p777_p5), 1, %s647_s10  }
  0x33   : > { %s438_s15 = sshll.u32 (!%p777_p5), %s795_s25, 3  ;;  %s180_s16 = scalar_lea.sflag (!%p777_p5), [#allocation3], %s795_s25 }
  0x34   : > { %s183_s19 = scalar_lea.vmem (!%p777_p5), [#allocation2], %s438_s15 }
  0x37   : > { %630 = dma.done.wait (%p732_p8), %s180_s16, 128  }
  0x38   : > { %632 = vsyncadd (%p732_p8), %s180_s16, 4294967168  ;;  %s439_s5 = sshll.u32 %s795_s25, 1  ;;  %s189_s18 = scalar_lea.sflag [#allocation6], %s795_s25 }
  0x39   : > { %s192_s20 = scalar_lea.vmem [#allocation5], %s439_s5 }
  0x3a   : > { %634 = dma.done.wait (%p732_p8), %s189_s18, 32  }
  0x3b   : > { %636 = vsyncadd (%p732_p8), %s189_s18, 4294967264  ;;  %v224_v0 = vlaneseq  ;;  %s813_s26 = scalar_lea.vmem [#allocation7], %s439_s5  ;;  %v667_v3 = vmov 0.0   ;;  %v229_v6 = vld [vmem:[%s183_s19] sm:$0xff]  ;;  %v230_v7 = vld [vmem:[%s192_s20] sm:$0x3] }
  0x3c   : > { %v244_v10 = vcombine.high %v229_v6, %v229_v6  ;;  %vm248_vm1 = vcmask 1043456   ;;  %v668_v30 = vmov 1966171168   ;;  %s448_s21 = sshll.u32 %s655_s12, 5  ;;  %s320_s27 = sshll.u32 %s813_s26, 4  ;;  %s321_s27 = int_to_ptr.vmem [resolvable:$true] %s320_s27 }
  0x3d   : > { %vm809_vm0 = vcmp.lt.s32.totalorder %v224_v0, 256  ;;  %v232_v2 = vshrl.u32 %v224_v0, 7  ;;  %v264_v17 = vand.u32 127, %v224_v0  ;;  %v285_v31 = vunpack.c.l.s4 %v668_v30  ;;  %s318_s3 = scalar_lea.hbm %s865_s2, %s448_s21  ;;  %s306_s7 = scalar_lea.sflag [#allocation4], %s795_s25 }
  0x3e   : > { %228 = vst.msk [vmem:[%s813_s26] sm:$0x3] %vm809_vm0, %v667_v3  ;;  %s579_s8 = scalar_lea.vmem %s321_s27, 32  ;;  %s669_s30 = smov [#allocation7]  }
  0x3f   : > { %v235_v4 = vsub.s32 0, %v232_v2  ;;  %v239_v5 = vsub.s32 1, %v232_v2  ;;  %v265_v22 = vadd.s32 128, %v264_v17  ;;  %v286_v33 = vunpack.c.0.s8 %v285_v31  ;;  %p580_p8 = scmp.ne.s32.totalorder %s321_s27, %s579_s8  ;;  %s583_s4 = sshll.u32 %s669_s30, 4  ;;  %s584_s4 = int_to_ptr.vmem [resolvable:$false] %s583_s4 }
  0x40   : > { %s585_s12 = scalar_lea.vmem %s584_s4, 64  ;;  %p586_p13 = scmp.lt.s32.totalorder %s321_s27, %s584_s4 }
  0x41   : > { %v236_v8 = vrot.slane %v230_v7, %v235_v4  ;;  %v240_v9 = vrot.slane %v230_v7, %v239_v5  ;;  %vm271_vm4 = vcmp.lt.s32.totalorder %v265_v22, 210  ;;  %v289_v39 = vsub.s32 %v286_v33, %v232_v2  ;;  %p581_p0 = pnand %p580_p8, %p736_p9  ;;  %p587_p5 = scmp.lt.s32.totalorder %s585_s12, %s579_s8 }
  0x43   : > { %vm241_vm2 = vcmp.eq.s32.totalorder %v232_v2, %v236_v8  ;;  %vm242_vm3 = vcmp.eq.s32.totalorder %v232_v2, %v240_v9  ;;  %p582_p3 = pneg %p581_p0  ;;  %p588_p12 = por %p587_p5, %p586_p13 }
  0x44   : > { %v246_v11 = vsel %vm241_vm2, %v229_v6, 0.0  ;;  %v247_v12 = vsel %vm242_vm3, %v244_v10, 0.0 }
  0x45   : > { %v249_v13 = vsel %vm248_vm1, %v246_v11, 0.0  ;;  %v256_v14 = vsel %vm248_vm1, %v247_v12, 0.0  ;;  %v274_v42 = vld [vmem:[%s813_s26] sm:$0x3]  ;;  %p589_p6 = pnand %p588_p12, %p582_p3 }
  0x46   : > { %v250_v15 = vrot.slane %v249_v13, 4  ;;  %v257_v16 = vrot.slane %v256_v14, 4 }
  0x48   : > { %v251_v18 = vadd.f32 %v250_v15, %v249_v13  ;;  %v258_v19 = vadd.f32 %v257_v16, %v256_v14 }
  0x4a   : > { %v252_v20 = vrot.slane %v251_v18, 2  ;;  %v259_v21 = vrot.slane %v258_v19, 2 }
  0x4c   : > { %v253_v23 = vadd.f32 %v252_v20, %v251_v18  ;;  %v260_v24 = vadd.f32 %v259_v21, %v258_v19 }
  0x4e   : > { %v254_v25 = vrot.slane %v253_v23, 1  ;;  %v261_v26 = vrot.slane %v260_v24, 1 }
  0x50   : > { %v255_v27 = vadd.f32 %v254_v25, %v253_v23  ;;  %v262_v28 = vadd.f32 %v261_v26, %v260_v24 }
  0x52   : > { %v273_v29 = vsel %vm271_vm4, %v262_v28, 1.0  ;;  %519 = vlog2.f32 %v255_v27 }
  0x53   : > { %521 = vlog2.f32 %v273_v29 }
  0x5f   : > { %v520_v32 = vpop.eup %519 }
  0x60   : > { %v522_v34 = vpop.eup %521  ;;  %v276_v35 = vmul.f32 0.6931472, %v520_v32 }
  0x61   : > { %v278_v36 = vmul.f32 0.6931472, %v522_v34 }
  0x62   : > { %v279_v37 = vsub.f32 0.0, %v276_v35 }
  0x63   : > { %v280_v38 = vsub.f32 0.0, %v278_v36 }
  0x65   : > { %v283_v40 = vcombine.low %v279_v37, %v280_v38 }
  0x67   : > { %v290_v41 = vrot.slane %v283_v40, %v289_v39 }
  0x69   : > { %v297_v43 = vrot.slane %v290_v41, %v289_v39 }
  0x6b   : > { %v299_v44 = vadd.f32 %v297_v43, %v274_v42 }
  0x6d   : > { %304 = vst.msk [vmem:[%s813_s26] sm:$0x3] %vm809_vm0, %v299_v44 }
  0x6e   : > { %592 = shalt.err (!%p589_p6)
}
  0x6f   : > { %s593_s6 = scalar_lea.hbm %s318_s3, 32  ;;  %s597_s16 = scalar_lea.hbm %s865_s2, 64 }
  0x70   : > { %p594_p7 = scmp.ne.s32.totalorder %s318_s3, %s593_s6  ;;  %p598_p4 = scmp.lt.s32.totalorder %s318_s3, %s865_s2 }
  0x71   : > { %p599_p10 = scmp.lt.s32.totalorder %s597_s16, %s593_s6 }
  0x72   : > { %p595_p1 = pnand %p594_p7, %p736_p9 }
  0x73   : > { %p600_p8 = por %p599_p10, %p598_p4 }
  0x74   : > { %p596_p2 = pneg %p595_p1 }
  0x76   : > { %p601_p0 = pnand %p600_p8, %p596_p2 }
  0x78   : > { %604 = shalt.err (!%p601_p0)
}
  0x79   : > { %453 = dma.vmem_to_hbm [thread:$0]  (%p736_p9), %s321_s27, 32, %s318_s3, %s306_s7  }
  0x7a PF: > { %s332_s18 = sand.u32 1, %s643_s9   ;;  %p874_p3 = scmp.ge.s32.totalorder %s663_s14, 2 }
  0x7b   : > { %s333_s20 = scalar_lea.sflag [#allocation4], %s332_s18 }
  0x7c   : > { %p463_p13 = pnand %p874_p3, %p743_p11 }
  0x7e   : > { %p464_p5 = pneg %p463_p13 }
  0x80   : > { %638 = dma.done.wait (%p464_p5), %s333_s20, 32  }
  0x81   : > { %640 = vsyncadd (%p464_p5), %s333_s20, 4294967264  ;;  %s21_s14 = sadd.s32 1, %s663_s14   ;;  %s875_s9 = smov %s647_s10 }
  0x82   : > { %p18_p12 = scmp.ge.s32.totalorder %s21_s14, 4   ;;  %s876_s10 = smov %s651_s11 }
  0x83   : > { %s877_s11 = smov %s741_s23  ;;  %s878_s12 = smov %s659_s13 }
  0x84   : > { %s879_s13 = smov %s881_s17  ;;  %20 = sbr.rel (!%p18_p12) target bundleno = 8 (0x8), region = 90 }
  0x89   :  { %338 = vsyncpa [#allocation3], 1 }
  0x8a   :  { %340 = vsyncpa [#allocation3 + $0x1], 1 }
  0x8b   :  { %341 = vsyncpa [#allocation6], 1 }
  0x8c   :  { %343 = vsyncpa [#allocation6 + $0x1], 1 }
  0x8d   :  { %344 = vsyncpa [#allocation4], 1 }
  0x8e   :  { %346 = vsyncpa [#allocation4 + $0x1], 1 }

</bundles_post_ra>
